<compile_context>
chip_gen: v6e
topology: v6e:2x2x1
jax: 0.10.0
libtpu: 0.0.40
codegen_flags: <defaults>
</compile_context>

<pallas_src>
import jax
import jax.numpy as jnp
from jax.experimental import pallas as pl
from jax.experimental.pallas import tpu as pltpu

LANE = 128
_VMEM_LIMIT = 32 * 1024 * 1024  # conservative: fits v5e/v6e/v7x scoped VMEM


def _round_up(v, m):
    return (v + m - 1) // m * m


# --------------------------------------------------------------------------
# Kernel 1: feature transform  support = x @ W   (row-tiled, weights resident)
# --------------------------------------------------------------------------
def transform_kernel(x_ref, w_ref, out_ref):
    out_ref[...] = jnp.dot(
        x_ref[...], w_ref[...], preferred_element_type=jnp.float32
    ).astype(out_ref.dtype)


def transform(x, w_pad, *, tm, out_dtype=jnp.bfloat16):
    N, fin = x.shape
    fout = w_pad.shape[1]
    cost = pl.CostEstimate(
        flops=2 * N * fin * fout,
        transcendentals=0,
        bytes_accessed=N * fin * x.dtype.itemsize
        + fin * fout * w_pad.dtype.itemsize
        + N * fout * jnp.dtype(out_dtype).itemsize,
    )
    return pl.pallas_call(
        transform_kernel,
        out_shape=jax.ShapeDtypeStruct((N, fout), out_dtype),
        grid=(N // tm,),
        in_specs=[
            pl.BlockSpec((tm, fin), lambda i: (i, 0)),
            pl.BlockSpec((fin, fout), lambda i: (0, 0)),
        ],
        out_specs=pl.BlockSpec((tm, fout), lambda i: (i, 0)),
        compiler_params=pltpu.CompilerParams(
            dimension_semantics=("parallel",),
            vmem_limit_bytes=_VMEM_LIMIT,
        ),
        cost_estimate=cost,
    )(x, w_pad)


# --------------------------------------------------------------------------
# Kernel 2: aggregation  out = act(adj @ support + b)
#   grid = (row tiles [parallel], reduction tiles [arbitrary])
#   f32 VMEM accumulator; bias + activation fused into the final K step.
# --------------------------------------------------------------------------
def make_aggregate_kernel(activation, nvalid):
    def kernel(adj_ref, s_ref, b_ref, out_ref, acc_ref):
        k = pl.program_id(1)

        @pl.when(k == 0)
        def _():
            acc_ref[...] = jnp.zeros_like(acc_ref)

        acc_ref[...] += jnp.dot(
            adj_ref[...], s_ref[...], preferred_element_type=jnp.float32
        )

        @pl.when(k == pl.num_programs(1) - 1)
        def _():
            y = acc_ref[...] + b_ref[...]
            if activation == "relu":
                out_ref[...] = jnp.maximum(y, 0.0).astype(out_ref.dtype)
            else:  # masked log_softmax over the first `nvalid` lanes
                lane = jax.lax.broadcasted_iota(jnp.int32, y.shape, 1)
                valid = lane < nvalid
                ym = jnp.where(valid, y, jnp.float32(-1e30))
                m = jnp.max(ym, axis=-1, keepdims=True)
                e = jnp.where(valid, jnp.exp(ym - m), 0.0)
                lse = jnp.log(jnp.sum(e, axis=-1, keepdims=True))
                out_ref[...] = (ym - m - lse).astype(out_ref.dtype)

    return kernel


def aggregate(adj_c, support, bias_row, *, activation, nvalid, out_dtype, tm, tk):
    N = adj_c.shape[0]
    fp = support.shape[1]
    kernel = make_aggregate_kernel(activation, nvalid)
    cost = pl.CostEstimate(
        flops=2 * N * N * fp,
        transcendentals=(N * fp if activation == "log_softmax" else 0),
        bytes_accessed=N * N * adj_c.dtype.itemsize
        + N * fp * support.dtype.itemsize
        + N * fp * jnp.dtype(out_dtype).itemsize,
    )
    return pl.pallas_call(
        kernel,
        out_shape=jax.ShapeDtypeStruct((N, fp), out_dtype),
        grid=(N // tm, N // tk),
        in_specs=[
            pl.BlockSpec((tm, tk), lambda i, k: (i, k)),
            pl.BlockSpec((tk, fp), lambda i, k: (k, 0)),
            pl.BlockSpec((1, fp), lambda i, k: (0, 0)),
        ],
        out_specs=pl.BlockSpec((tm, fp), lambda i, k: (i, 0)),
        scratch_shapes=[pltpu.VMEM((tm, fp), jnp.float32)],
        compiler_params=pltpu.CompilerParams(
            dimension_semantics=("parallel", "arbitrary"),
            vmem_limit_bytes=_VMEM_LIMIT,
        ),
        cost_estimate=cost,
    )(adj_c, support, bias_row)


# --------------------------------------------------------------------------
# Full GCN forward (eval mode)
# --------------------------------------------------------------------------
def gcn_forward(x, adj, w1, b1, w2, b2, *, tm=None, tk=None):
    N, nfeat = x.shape
    nhid = w1.shape[1]
    nclass = w2.shape[1]

    hp = _round_up(nhid, LANE)   # lane-padded hidden dim
    cp = _round_up(nclass, LANE)  # lane-padded class dim

    # Tiles: default 512 (≈1 MiB bf16 adj tile ×2 buffers; safe on v7x 64 MiB).
    tm = tm or min(N, 512)
    tk = tk or min(N, 512)
    assert N % tm == 0 and N % tk == 0, "N must be divisible by tile sizes"

    compute_dtype = jnp.bfloat16
    adj_c = adj.astype(compute_dtype)
    x_c = x.astype(compute_dtype)

    # Zero-pad weights/biases to lane-dense widths (padding is exactly zero,
    # so it never contaminates the valid columns).
    w1p = jnp.zeros((nfeat, hp), compute_dtype).at[:, :nhid].set(
        w1.astype(compute_dtype))
    b1p = jnp.zeros((1, hp), jnp.float32).at[:, :nhid].set(
        b1.reshape(1, nhid).astype(jnp.float32))
    w2p = jnp.zeros((hp, cp), compute_dtype).at[:nhid, :nclass].set(
        w2.astype(compute_dtype))
    b2p = jnp.zeros((1, cp), jnp.float32).at[:, :nclass].set(
        b2.reshape(1, nclass).astype(jnp.float32))

    # Layer 1: support1 = x @ W1 ; h = relu(adj @ support1 + b1)
    support1 = transform(x_c, w1p, tm=tm, out_dtype=compute_dtype)       # [N, hp]
    h = aggregate(adj_c, support1, b1p, activation="relu", nvalid=nhid,
                  out_dtype=compute_dtype, tm=tm, tk=tk)                  # [N, hp]

    # TODO(synk): training-mode dropout (pltpu.prng_random_bits) not emitted;
    # the reference forward with training=False is the identity here.

    # Layer 2: support2 = h @ W2 ; y = adj @ support2 + b2 ; log_softmax
    support2 = transform(h, w2p, tm=tm, out_dtype=compute_dtype)          # [N, cp]
    y = aggregate(adj_c, support2, b2p, activation="log_softmax",
                  nvalid=nclass, out_dtype=jnp.float32, tm=tm, tk=tk)     # [N, cp]

    return y[:, :nclass]


if __name__ == "__main__":
    # Small but grid-exercising shapes (grid = (2, 2) with tm = tk = 128).
    N, nfeat, nhid, nclass = 256, 64, 64, 16
    dropout = 0.5  # unused in eval mode

    key = jax.random.PRNGKey(0)
    kx, kadj, kw1, kb1, kw2, kb2 = jax.random.split(key, 6)

    x = jax.random.normal(kx, (N, nfeat), dtype=jnp.float32)

    # Symmetric row-normalized adjacency with self-loops (typical GCN input).
    a = (jax.random.uniform(kadj, (N, N)) < 0.05).astype(jnp.float32)
    a = jnp.maximum(a, a.T) + jnp.eye(N, dtype=jnp.float32)
    deg = jnp.sum(a, axis=1, keepdims=True)
    adj = a / deg

    # GraphConvolution init: uniform(-stdv, stdv), stdv = 1/sqrt(out_features).
    stdv1 = 1.0 / jnp.sqrt(jnp.float32(nhid))
    w1 = jax.random.uniform(kw1, (nfeat, nhid), minval=-stdv1, maxval=stdv1,
                            dtype=jnp.float32)
    b1 = jax.random.uniform(kb1, (nhid,), minval=-stdv1, maxval=stdv1,
                            dtype=jnp.float32)
    stdv2 = 1.0 / jnp.sqrt(jnp.float32(nclass))
    w2 = jax.random.uniform(kw2, (nhid, nclass), minval=-stdv2, maxval=stdv2,
                            dtype=jnp.float32)
    b2 = jax.random.uniform(kb2, (nclass,), minval=-stdv2, maxval=stdv2,
                            dtype=jnp.float32)

    out = gcn_forward(x, adj, w1, b1, w2, b2, tm=128, tk=128)
    out = jax.block_until_ready(out)

    # Pure-JAX f32 reference (eval-mode forward).
    h_ref = jnp.maximum(adj @ (x @ w1) + b1, 0.0)
    y_ref = adj @ (h_ref @ w2) + b2
    ref = jax.nn.log_softmax(y_ref, axis=1)

    assert out.shape == (N, nclass)
    max_err = jnp.max(jnp.abs(out - ref))
    # bf16 MXU inputs with f32 accumulation -> modest tolerance.
    assert max_err < 5e-2, f"max abs err {max_err}"

    print("KERNEL_OK")
</pallas_src>

<mosaic_0001>
module attributes {stable_mosaic.version = 11 : i64} {
  func.func @transform_kernel(%arg0: i32, %arg1: memref<128x64xbf16, #tpu.memory_space<vmem>>, %arg2: memref<64x128xbf16, #tpu.memory_space<vmem>>, %arg3: memref<128x128xbf16, #tpu.memory_space<vmem>>) attributes {dimension_semantics = [#tpu.dimension_semantics<parallel>], iteration_bounds = array<i64: 2>, scalar_prefetch = 0 : i64, scratch_operands = 0 : i64, tpu.core_type = #tpu.core_type<tc>, window_params = [{transform_indices = @transform_0, window_bounds = array<i64: 128, 64>}, {pipeline_mode = #tpu.pipeline_mode<synchronous>, transform_indices = @transform_1, window_bounds = array<i64: 64, 128>}, {transform_indices = @transform_2, window_bounds = array<i64: 128, 128>}]} {
    %c0 = arith.constant 0 : index
    %c0_0 = arith.constant 0 : index
    %0 = vector.load %arg1[%c0, %c0_0] : memref<128x64xbf16, #tpu.memory_space<vmem>>, vector<128x64xbf16>
    %c0_1 = arith.constant 0 : index
    %c0_2 = arith.constant 0 : index
    %1 = vector.load %arg2[%c0_1, %c0_2] : memref<64x128xbf16, #tpu.memory_space<vmem>>, vector<64x128xbf16>
    %cst = arith.constant dense<0.000000e+00> : vector<128x128xf32>
    %2 = tpu.matmul %0, %1, %cst {dimension_numbers = #tpu.dot_dimension_numbers<[1], [0], [0], [1], [0, 0, 1, 1], [], []>} : vector<128x64xbf16>, vector<64x128xbf16>, vector<128x128xf32> -> vector<128x128xf32>
    %3 = arith.truncf %2 : vector<128x128xf32> to vector<128x128xbf16>
    %c0_3 = arith.constant 0 : index
    %c0_4 = arith.constant 0 : index
    %4 = vector.load %arg3[%c0_3, %c0_4] : memref<128x128xbf16, #tpu.memory_space<vmem>>, vector<128x128xbf16>
    tpu.vector_store %arg3[%c0_3, %c0_4], %3 {strides = array<i32>} : memref<128x128xbf16, #tpu.memory_space<vmem>>, vector<128x128xbf16>,
    return
  }
  func.func @transform_0(%arg0: i32) -> (i32, i32) {
    %c0_i32 = arith.constant 0 : i32
    %c0_i32_0 = arith.constant 0 : i32
    return %arg0, %c0_i32 : i32, i32
  }
  func.func @transform_1(%arg0: i32) -> (i32, i32) {
    %c0_i32 = arith.constant 0 : i32
    %c0_i32_0 = arith.constant 0 : i32
    %c0_i32_1 = arith.constant 0 : i32
    return %c0_i32, %c0_i32_0 : i32, i32
  }
  func.func @transform_2(%arg0: i32) -> (i32, i32) {
    %c0_i32 = arith.constant 0 : i32
    %c0_i32_0 = arith.constant 0 : i32
    return %arg0, %c0_i32 : i32, i32
  }
}

</mosaic_0001>

<bundles_post_ra>
// kernel: tpu_custom_call.1
= control target key start
LH: loop header
LB: loop body
LE: loop exit
PB: predicated region body
PF: predicated region fallthrough
CT: control target
= control target key end

     0   :  { %7 = vsyncpa [#allocation3], 0  ;;  %s926_s0 = inlined_call_operand.vmem [shape: bf16[256,64], index: 0, kind: input, shape index: {}]   ;;  %s927_s1 = inlined_call_operand.vmem [shape: bf16[64,128], index: 1, kind: input, shape index: {}]   ;;  %s928_s2 = inlined_call_operand.hbm [shape: bf16[256,128], index: 2, kind: output, shape index: {}]  }
   0x1   :  { %9 = vsyncpa [#allocation3 + $0x1], 0  ;;  %s801_s9 = smov 0   ;;  %s803_s10 = smov 0  }
   0x2   :  { %s805_s11 = smov 0   ;;  %s807_s12 = smov 0  }
   0x3 LB: > { %s822_s13 = sadd.s32 4294967295, %s781_s12   ;;  %s512_s14 = sadd.s32 4294967294, %s781_s12   ;;  %s781_s12 = sphi %s807_s12, %s934_s12   ;;  %s777_s11 = sphi %s805_s11, %s933_s11   ;;  %s773_s10 = sphi %s803_s10, %s932_s10   ;;  %s769_s9 = sphi %s801_s9, %s931_s9  }
   0x4   : > { %s826_s15 = sadd.s32 1, %s781_s12   ;;  %s69_s16 = sadd.s32 1, %s777_s11 }
   0x5   : > { %s66_s17 = ssub.s32 %s781_s12, %s826_s15  ;;  %p79_p0 = scmp.ne.s32.totalorder %s777_s11, %s773_s10 }
   0x6   : > { %p67_p1 = scmp.eq.s32.totalorder %s66_s17, 0  ;;  %p80_p2 = scmp.eq.s32.totalorder %s822_s13, 1 }
   0x7   : > { %p85_p3 = scmp.ne.s32.totalorder %s773_s10, %s769_s9  ;;  %p86_p4 = scmp.eq.s32.totalorder %s512_s14, 1 }
   0x8   : > { %s837_s18 = scalar_select %p67_p1, %s777_s11, %s69_s16  }
   0x9   : > { %p839_p5 = por %p80_p2, %p79_p0  ;;  %p843_p6 = por %p86_p4, %p85_p3 }
   0xa   : > { %p515_p7 = scmp.ge.s32.totalorder %s781_s12, 1  ;;  %p116_p8 = scmp.lt.s32.totalorder %s781_s12, 3 }
   0xc   : > { %p117_p9 = pnand %p515_p7, %p116_p8 }
   0xd   : > { %s517_s23 = sshll.u32 (!%p117_p9), %s822_s13, 4  ;;  %s135_s6 = sand.u32 (!%p117_p9), 1, %s773_s10  }
   0xe   : > { %120 = sbr.rel (%p117_p9) target bundleno = 259 (0x103), region = 28  ;;  %p139_p10 = scmp.lt.s32.totalorder (!%p117_p9), %s517_s23, 31 }
   0xf   : > { %s516_s7 = sshll.u32 (!%p117_p9), %s135_s6, 6  ;;  %s576_s14 = sshll.u32 (!%p117_p9), %s822_s13, 10 }
  0x10   : > { %s137_s8 = scalar_lea.vmem (!%p117_p9), [#allocation2], %s516_s7  ;;  %s880_s22 = scalar_lea.hbm (!%p117_p9), %s928_s2, %s576_s14 }
  0x11   : > { %s450_s16 = sshll.u32 (!%p117_p9), %s137_s8, 4  ;;  %s886_s13 = scalar_lea.sflag (!%p117_p9), [#allocation3], %s135_s6  ;;  %s882_s16 = int_to_ptr.vmem [resolvable:$true] %s450_s16 }
  0x12   : > { %s783_s24 = smov (!%p117_p9), [#allocation2]  }
  0x13   : > { %v709_v0 = vld [vmem:[%s927_s1 + $0x18] sm:$0xff]   ;;  %v710_v1 = vld [vmem:[%s927_s1 + $0x10] sm:$0xff]   ;;  %s936_s23 = smov (!%p139_p10, %s517_s23), 31  ;;  %v711_v2 = vld [vmem:[%s927_s1 + $0x8] sm:$0xff]   ;;  %vm234_vm0 = vcmask 523264   ;;  %s725_s25 = sshll.u32 %s783_s24, 4  ;;  %s726_s25 = int_to_ptr.vmem [resolvable:$false] %s725_s25 }
  0x14   : > { %636 = vmatprep.subr.bf16.mxu0 %v709_v0  ;;  %660 = vmatprep.subr.bf16.mxu1 %v709_v0  ;;  %s518_s28 = sshll.u32 %s936_s23, 2  ;;  %v712_v3 = vld [vmem:[%s927_s1] sm:$0xff]   ;;  %s721_s23 = scalar_lea.vmem %s882_s16, 1024 }
  0x15   : > { %637 = vmatpush3.bf16.msra.mxu0 %v709_v0  ;;  %664 = vmatpush3.bf16.msra.mxu1 %v709_v0  ;;  %s142_s5 = scalar_lea.vmem %s926_s0, %s518_s28  ;;  %p722_p11 = scmp.ne.s32.totalorder %s882_s16, %s721_s23 }
  0x16   : > { %638 = vmatprep.subr.bf16.mxu0 %v710_v1  ;;  %661 = vmatprep.subr.bf16.mxu1 %v710_v1  ;;  %v713_v4 = vld [vmem:[%s142_s5] sm:$0xff]   ;;  %v715_v6 = vld [vmem:[%s142_s5 + $0x8] sm:$0xff]   ;;  %v717_v8 = vld [vmem:[%s142_s5 + $0x10] sm:$0xff]   ;;  %s727_s26 = scalar_lea.vmem %s726_s25, 2048  ;;  %p728_p0 = scmp.lt.s32.totalorder %s882_s16, %s726_s25 }
  0x17   : > { %v714_v5 = vld [vmem:[%s142_s5 + $0x20] sm:$0xff]   ;;  %644 = vmatprep.mubr.msk.bf16.mxu0 %vm234_vm0, %v713_v4  ;;  %v716_v7 = vld [vmem:[%s142_s5 + $0x28] sm:$0xff]   ;;  %v718_v9 = vld [vmem:[%s142_s5 + $0x30] sm:$0xff]   ;;  %p723_p12 = pnand %p722_p11, %p839_p5  ;;  %p729_p1 = scmp.lt.s32.totalorder %s727_s26, %s721_s23 }
  0x18   : > { %652 = vmatprep.mubr.msk.bf16.mxu1 %vm234_vm0, %v714_v5  ;;  %v719_v10 = vld [vmem:[%s142_s5 + $0x18] sm:$0xff]  }
  0x19   : > { %639 = vmatpush3.bf16.msra.mxu0 %v710_v1  ;;  %665 = vmatpush3.bf16.msra.mxu1 %v710_v1  ;;  %v720_v11 = vld [vmem:[%s142_s5 + $0x38] sm:$0xff]   ;;  %p724_p13 = pneg %p723_p12  ;;  %p730_p2 = por %p729_p1, %p728_p0 }
  0x1a   : > { %640 = vmatprep.subr.bf16.mxu0 %v711_v2  ;;  %662 = vmatprep.subr.bf16.mxu1 %v711_v2 }
  0x1b   : > { %p731_p3 = pnand %p730_p2, %p724_p13 }
  0x1d   : > { %641 = vmatpush3.bf16.msra.mxu0 %v711_v2  ;;  %666 = vmatpush3.bf16.msra.mxu1 %v711_v2 }
  0x1e   : > { %642 = vmatprep.subr.bf16.mxu0 %v712_v3  ;;  %663 = vmatprep.subr.bf16.mxu1 %v712_v3 }
  0x21   : > { %643 = vmatpush3.bf16.msra.mxu0 %v712_v3  ;;  %667 = vmatpush3.bf16.msra.mxu1 %v712_v3 }
  0x24   : > { %645 = vmatmul.mubr.msk.bf16.vlgmr.msra.gmra.mxu0 %vm234_vm0, %v715_v6  ;;  %653 = vmatmul.mubr.msk.bf16.vlgmr.msra.gmra.mxu1 %vm234_vm0, %v716_v7 }
  0x25   : > { %648 = vmatprep.mubr.msk.bf16.mxu0 %vm234_vm0, %v717_v8  ;;  %656 = vmatprep.mubr.msk.bf16.mxu1 %vm234_vm0, %v718_v9 }
  0x2c   : > { %649 = vmatmul.mubr.msk.bf16.gmra.mxu0 %vm234_vm0, %v719_v10  ;;  %657 = vmatmul.mubr.msk.bf16.gmra.mxu1 %vm234_vm0, %v720_v11 }
  0xe4   : > { %v646_v12 = vpop.f32.mrf.mxu0  ;;  %v654_v13 = vpop.f32.mrf.mxu1 }
  0xe6   : > { %v293_v14 = vpop.f32.mrf.mxu0  ;;  %v325_v15 = vpop.f32.mrf.mxu1 }
  0xe8   : > { %v647_v16 = vpop.f32.mrf.mxu0  ;;  %v655_v17 = vpop.f32.mrf.mxu1 }
  0xe9   : > { %v585_v18 = vpack.c.bf16 %v647_v16, %v646_v12  ;;  %v605_v19 = vpack.c.bf16 %v655_v17, %v654_v13 }
  0xea   : > { %v296_v20 = vpop.f32.mrf.mxu0  ;;  %v328_v21 = vpop.f32.mrf.mxu1 }
  0xeb   : > { %617 = vst [vmem:[%s137_s8 + $0x8] sm:$0xff] %v585_v18   ;;  %621 = vst [vmem:[%s137_s8 + $0x28] sm:$0xff] %v605_v19   ;;  %v580_v22 = vpack.c.bf16 %v296_v20, %v293_v14  ;;  %v600_v23 = vpack.c.bf16 %v328_v21, %v325_v15 }
  0xec   : > { %v650_v24 = vpop.f32.mrf.mxu0  ;;  %v658_v25 = vpop.f32.mrf.mxu1 }
  0xed   : > { %581 = vst [vmem:[%s137_s8] sm:$0xff] %v580_v22   ;;  %620 = vst [vmem:[%s137_s8 + $0x20] sm:$0xff] %v600_v23  }
  0xee   : > { %v309_v26 = vpop.f32.mrf.mxu0  ;;  %v341_v27 = vpop.f32.mrf.mxu1 }
  0xf0   : > { %v651_v28 = vpop.f32.mrf.mxu0  ;;  %v659_v29 = vpop.f32.mrf.mxu1 }
  0xf1   : > { %v595_v30 = vpack.c.bf16 %v651_v28, %v650_v24  ;;  %v615_v31 = vpack.c.bf16 %v659_v29, %v658_v25 }
  0xf2   : > { %v312_v32 = vpop.f32.mrf.mxu0  ;;  %v344_v33 = vpop.f32.mrf.mxu1 }
  0xf3   : > { %619 = vst [vmem:[%s137_s8 + $0x18] sm:$0xff] %v595_v30   ;;  %623 = vst [vmem:[%s137_s8 + $0x38] sm:$0xff] %v615_v31   ;;  %v590_v34 = vpack.c.bf16 %v312_v32, %v309_v26  ;;  %v610_v35 = vpack.c.bf16 %v344_v33, %v341_v27 }
  0xf5   : > { %618 = vst [vmem:[%s137_s8 + $0x10] sm:$0xff] %v590_v34   ;;  %622 = vst [vmem:[%s137_s8 + $0x30] sm:$0xff] %v610_v35  }
  0xf6   : > { %734 = shalt.err (!%p731_p3)
}
  0xf7   : > { %s735_s27 = scalar_lea.hbm %s880_s22, 1024  ;;  %s739_s30 = scalar_lea.hbm %s928_s2, 2048 }
  0xf8   : > { %p736_p4 = scmp.ne.s32.totalorder %s880_s22, %s735_s27  ;;  %p740_p9 = scmp.lt.s32.totalorder %s880_s22, %s928_s2 }
  0xf9   : > { %p741_p10 = scmp.lt.s32.totalorder %s739_s30, %s735_s27 }
  0xfa   : > { %p737_p7 = pnand %p736_p4, %p839_p5 }
  0xfb   : > { %p742_p11 = por %p741_p10, %p740_p9 }
  0xfc   : > { %p738_p8 = pneg %p737_p7 }
  0xfe   : > { %p743_p12 = pnand %p742_p11, %p738_p8 }
 0x100   : > { %746 = shalt.err (!%p743_p12)
}
 0x101   : > { %s784_s5 = smov 64   ;;  %s785_s6 = smov 4  }
 0x102   : > { %668 = dma.vmem_to_hbm [thread:$0]  (%p839_p5), %s882_s16, 1024, %s880_s22, %s886_s13, %s784_s5, %s784_s5, %s785_s6  }
 0x103 PF: > { %p674_p13 = scmp.ge.s32.totalorder %s781_s12, 2  ;;  %s465_s7 = sand.u32 1, %s769_s9  }
 0x104   : > { %s466_s8 = scalar_lea.sflag [#allocation3], %s465_s7 }
 0x105   : > { %p671_p0 = pnand %p674_p13, %p843_p6 }
 0x107   : > { %p672_p1 = pneg %p671_p0 }
 0x109   : > { %764 = dma.done.wait (%p672_p1), %s466_s8, 1024  }
 0x10a   : > { %766 = vsyncadd (%p672_p1), %s466_s8, 4294966272  ;;  %p12_p2 = scmp.ge.s32.totalorder %s826_s15, 4   ;;  %s931_s9 = smov %s773_s10 }
 0x10b   : > { %s932_s10 = smov %s777_s11  ;;  %s933_s11 = smov %s837_s18 }
 0x10c   : > { %s934_s12 = smov %s826_s15  ;;  %14 = sbr.rel (!%p12_p2) target bundleno = 3 (0x3), region = 63 }
 0x111   :  { %471 = vsyncpa [#allocation3], 1 }
 0x112   :  { %473 = vsyncpa [#allocation3 + $0x1], 1 }

</bundles_post_ra>
